<compile_context>
chip_gen: v6e
topology: v6e:2x2x1
jax: 0.10.0
libtpu: 0.0.40
codegen_flags: <defaults>
</compile_context>

<pallas_src>
import jax
import jax.numpy as jnp
from jax import lax
from jax.experimental import pallas as pl
from jax.experimental.pallas import tpu as pltpu

TEMPERATURE = 10.0


def _selection_regression_kernel(x_ref, la_ref, g_ref, w_ref, b_ref,
                                 pred_ref, prob_ref, wp_acc):
    i = pl.program_id(0)

    @pl.when(i == 0)
    def _init():
        wp_acc[...] = jnp.zeros_like(wp_acc)

    # Soft gumbel-softmax over the input_dim axis (f32, exact divide so each
    # row of the exported probabilities sums to 1).
    logits = (la_ref[...] + g_ref[...]) * (1.0 / TEMPERATURE)
    m = jnp.max(logits, axis=-1, keepdims=True)
    e = jnp.exp(logits - m)
    probs = e / jnp.sum(e, axis=-1, keepdims=True)
    prob_ref[...] = probs.astype(prob_ref.dtype)

    # Fold the regression weight into this probability tile on the VPU/XLU:
    #   wp += sum_f w[f] * probs[f, :]   -> (1, D)
    # (a (1,F)x(F,D) matmul would occupy <=1/128 of the MXU rows; the mul and
    #  sublane-reduce slots are otherwise idle here, so this is free filler.)
    wp_acc[...] += jnp.sum(probs * w_ref[...], axis=0, keepdims=True)

    @pl.when(i == pl.num_programs(0) - 1)
    def _finalize():
        # preds_row = wp ·_D x  -> (1, B), lane-dense (unmasked stores).
        preds = lax.dot_general(
            wp_acc[...], x_ref[...],
            dimension_numbers=(((1,), (1,)), ((), ())),
            preferred_element_type=jnp.float32)
        # Scalar bias read from SMEM, broadcast on the VPU.
        pred_ref[...] = (preds + b_ref[0, 0]).astype(pred_ref.dtype)


def _choose_tf(feature_dim, input_dim, dtype_bytes=4, vmem_budget_bytes=32 << 20):
    """Pick an F-tile so the per-step working set (3 double-buffered (tf, D)
    f32 streams: log_alphas, gumbel, probabilities) stays well inside the
    smallest default scoped-VMEM budget across generations (v7x: 32 MiB)."""
    per_row = 2 * 3 * input_dim * dtype_bytes          # double-buffered streams
    max_tf = max(8, (vmem_budget_bytes // 2) // per_row)
    tf = min(feature_dim, max_tf)
    tf = max(8, (tf // 8) * 8)                          # sublane multiple
    while tf > 8 and feature_dim % tf != 0:
        tf -= 8
    if feature_dim % tf != 0:
        tf = feature_dim
    return tf


def selection_and_regression(inputs, log_alphas, gumbel_noise, reg_w, reg_b,
                             *, tf=None):
    B, D = inputs.shape
    F_, D2 = log_alphas.shape
    assert D == D2 and reg_w.shape == (1, F_)

    if tf is None:
        tf = _choose_tf(F_, D)
    assert F_ % tf == 0
    grid = (F_ // tf,)

    # Host-side layout plumbing (free): weight as an (F, 1) column so the
    # in-kernel fold is a lane-broadcast multiply + sublane reduce (no
    # transpose in the kernel); bias as an SMEM (1, 1) scalar.
    reg_w_col = reg_w.reshape(F_, 1).astype(jnp.float32)
    reg_b2 = reg_b.reshape(1, 1).astype(jnp.float32)

    out_shape = (
        jax.ShapeDtypeStruct((1, B), jnp.float32),    # predictions (lane-dense)
        jax.ShapeDtypeStruct((F_, D), jnp.float32),   # probabilities
    )

    cost = pl.CostEstimate(
        flops=7 * F_ * D + 2 * B * D,
        transcendentals=F_ * D,
        bytes_accessed=4 * (B * D + 3 * F_ * D + F_ + B + 1),
    )

    pred_row, probs = pl.pallas_call(
        _selection_regression_kernel,
        out_shape=out_shape,
        grid_spec=pltpu.PrefetchScalarGridSpec(
            num_scalar_prefetch=0,
            grid=grid,
            in_specs=[
                pl.BlockSpec((B, D), lambda i: (0, 0)),             # inputs (resident)
                pl.BlockSpec((tf, D), lambda i: (i, 0)),            # log_alphas tile
                pl.BlockSpec((tf, D), lambda i: (i, 0)),            # gumbel tile
                pl.BlockSpec((tf, 1), lambda i: (i, 0)),            # reg_w column tile
                pl.BlockSpec(memory_space=pltpu.MemorySpace.SMEM),  # reg_b (1,1)
            ],
            out_specs=(
                pl.BlockSpec((1, B), lambda i: (0, 0)),             # predictions
                pl.BlockSpec((tf, D), lambda i: (i, 0)),            # probabilities tile
            ),
            scratch_shapes=[pltpu.VMEM((1, D), jnp.float32)],       # wp accumulator
        ),
        compiler_params=pltpu.CompilerParams(
            dimension_semantics=("arbitrary",),   # F axis is a reduction for wp/preds
            vmem_limit_bytes=32 << 20,
        ),
        cost_estimate=cost,
    )(inputs, log_alphas, gumbel_noise, reg_w_col, reg_b2)

    # (1, B) -> (B, 1): identical flat order, pure reshape on the host.
    return pred_row.reshape(B, 1), probs


def reference(inputs, log_alphas, gumbel_noise, reg_w, reg_b):
    logits = (log_alphas + gumbel_noise) / TEMPERATURE
    probs = jax.nn.softmax(logits, axis=-1)
    feats = inputs @ probs.T
    preds = feats @ reg_w.T + reg_b.reshape(1, 1)
    return preds, probs


if __name__ == "__main__":
    key = jax.random.PRNGKey(0)
    k_x, k_g, k_w, k_b = jax.random.split(key, 4)

    B = 8             # batch
    INPUT_DIM = 16    # input_dim
    FEATURE_DIM = 32  # feature_dim

    # Inputs
    x = jax.random.normal(k_x, (B, INPUT_DIM), dtype=jnp.float32)

    # Parameters (deterministic init; log_alphas = ones as in the module __init__)
    log_alphas = jnp.ones((FEATURE_DIM, INPUT_DIM), dtype=jnp.float32)
    bound = 1.0 / jnp.sqrt(float(FEATURE_DIM))
    reg_w = jax.random.uniform(k_w, (1, FEATURE_DIM), jnp.float32, -bound, bound)
    reg_b = jax.random.uniform(k_b, (1,), jnp.float32, -bound, bound)

    # Deterministic Gumbel(0,1) noise for the gumbel-softmax (glue, not kernel)
    gumbel_noise = jax.random.gumbel(k_g, (FEATURE_DIM, INPUT_DIM), dtype=jnp.float32)

    ref_preds, ref_probs = reference(x, log_alphas, gumbel_noise, reg_w, reg_b)

    # Exercise both the single-tile path (tf=None -> F fits in one tile) and
    # the multi-step accumulator grid (tf=8 -> 4 grid steps).
    for tf in (None, 8):
        preds, probs = selection_and_regression(
            x, log_alphas, gumbel_noise, reg_w, reg_b, tf=tf)
        preds = jax.block_until_ready(preds)
        probs = jax.block_until_ready(probs)
        assert preds.shape == (B, 1) and probs.shape == (FEATURE_DIM, INPUT_DIM)
        assert jnp.allclose(probs, ref_probs, atol=1e-5, rtol=1e-5)
        # preds tolerance slightly relaxed: the two matmuls are re-associated
        # (x @ probs.T) @ w.T  ->  (w-folded probs) ·_D x.
        assert jnp.allclose(preds, ref_preds, atol=1e-4, rtol=1e-4)

    print("KERNEL_OK")
</pallas_src>

<mosaic_0001>
module attributes {stable_mosaic.version = 11 : i64} {
  func.func @_selection_regression_kernel(%arg0: i32, %arg1: memref<8x16xf32, #tpu.memory_space<vmem>>, %arg2: memref<32x16xf32, #tpu.memory_space<vmem>>, %arg3: memref<32x16xf32, #tpu.memory_space<vmem>>, %arg4: memref<32x1xf32, #tpu.memory_space<vmem>>, %arg5: memref<1x1xf32, #tpu.memory_space<smem>>, %arg6: memref<1x8xf32, #tpu.memory_space<vmem>>, %arg7: memref<32x16xf32, #tpu.memory_space<vmem>>, %arg8: memref<1x16xf32, #tpu.memory_space<vmem>>) attributes {dimension_semantics = [#tpu.dimension_semantics<arbitrary>], iteration_bounds = array<i64: 1>, scalar_prefetch = 0 : i64, scratch_operands = 1 : i64, tpu.core_type = #tpu.core_type<tc>, window_params = [{pipeline_mode = #tpu.pipeline_mode<synchronous>, transform_indices = @transform_0, window_bounds = array<i64: 8, 16>}, {transform_indices = @transform_1, window_bounds = array<i64: 32, 16>}, {transform_indices = @transform_2, window_bounds = array<i64: 32, 16>}, {transform_indices = @transform_3, window_bounds = array<i64: 32, 1>}, {transform_indices = @transform_4, window_bounds = array<i64: 1, 1>}, {pipeline_mode = #tpu.pipeline_mode<synchronous>, transform_indices = @transform_5, window_bounds = array<i64: 1, 8>}, {transform_indices = @transform_6, window_bounds = array<i64: 32, 16>}]} {
    %c0_i32 = arith.constant 0 : i32
    %0 = arith.cmpi eq, %arg0, %c0_i32 : i32
    %1 = arith.extui %0 : i1 to i32
    %c0_i32_0 = arith.constant 0 : i32
    %2 = arith.cmpi ne, %1, %c0_i32_0 : i32
    scf.if %2 {
      %cst_17 = arith.constant 0.000000e+00 : f32
      %29 = vector.broadcast %cst_17 : f32 to vector<1x16xf32>
      %c0_18 = arith.constant 0 : index
      %c0_19 = arith.constant 0 : index
      %30 = vector.load %arg8[%c0_18, %c0_19] : memref<1x16xf32, #tpu.memory_space<vmem>>, vector<1x16xf32>
      tpu.vector_store %arg8[%c0_18, %c0_19], %29 {strides = array<i32>} : memref<1x16xf32, #tpu.memory_space<vmem>>, vector<1x16xf32>,
    } else {
    }
    %c0 = arith.constant 0 : index
    %c0_1 = arith.constant 0 : index
    %3 = vector.load %arg2[%c0, %c0_1] : memref<32x16xf32, #tpu.memory_space<vmem>>, vector<32x16xf32>
    %c0_2 = arith.constant 0 : index
    %c0_3 = arith.constant 0 : index
    %4 = vector.load %arg3[%c0_2, %c0_3] : memref<32x16xf32, #tpu.memory_space<vmem>>, vector<32x16xf32>
    %5 = arith.addf %3, %4 : vector<32x16xf32>
    %cst = arith.constant 1.000000e-01 : f32
    %6 = vector.broadcast %cst : f32 to vector<32x16xf32>
    %7 = arith.mulf %5, %6 : vector<32x16xf32>
    %cst_4 = arith.constant dense<0xFF800000> : vector<32xf32>
    %8 = vector.multi_reduction <maximumf>, %7, %cst_4 [1] : vector<32x16xf32> to vector<32xf32>
    %9 = vector.shape_cast %8 : vector<32xf32> to vector<32x1xf32>
    %10 = vector.broadcast %9 : vector<32x1xf32> to vector<32x16xf32>
    %11 = arith.subf %7, %10 : vector<32x16xf32>
    %12 = math.exp %11 : vector<32x16xf32>
    %cst_5 = arith.constant dense<0.000000e+00> : vector<32xf32>
    %13 = vector.multi_reduction <add>, %12, %cst_5 [1] : vector<32x16xf32> to vector<32xf32>
    %14 = vector.shape_cast %13 : vector<32xf32> to vector<32x1xf32>
    %15 = vector.broadcast %14 : vector<32x1xf32> to vector<32x16xf32>
    %16 = arith.divf %12, %15 : vector<32x16xf32>
    %c0_6 = arith.constant 0 : index
    %c0_7 = arith.constant 0 : index
    %17 = vector.load %arg7[%c0_6, %c0_7] : memref<32x16xf32, #tpu.memory_space<vmem>>, vector<32x16xf32>
    tpu.vector_store %arg7[%c0_6, %c0_7], %16 {strides = array<i32>} : memref<32x16xf32, #tpu.memory_space<vmem>>, vector<32x16xf32>,
    %c0_8 = arith.constant 0 : index
    %c0_9 = arith.constant 0 : index
    %18 = vector.load %arg8[%c0_8, %c0_9] : memref<1x16xf32, #tpu.memory_space<vmem>>, vector<1x16xf32>
    %c0_10 = arith.constant 0 : index
    %c0_11 = arith.constant 0 : index
    %19 = vector.load %arg4[%c0_10, %c0_11] : memref<32x1xf32, #tpu.memory_space<vmem>>, vector<32x1xf32>
    %20 = vector.broadcast %19 : vector<32x1xf32> to vector<32x16xf32>
    %21 = arith.mulf %16, %20 : vector<32x16xf32>
    %cst_12 = arith.constant dense<0.000000e+00> : vector<16xf32>
    %22 = vector.multi_reduction <add>, %21, %cst_12 [0] : vector<32x16xf32> to vector<16xf32>
    %23 = vector.shape_cast %22 : vector<16xf32> to vector<1x16xf32>
    %24 = arith.addf %18, %23 : vector<1x16xf32>
    %c0_13 = arith.constant 0 : index
    %c0_14 = arith.constant 0 : index
    %25 = vector.load %arg8[%c0_13, %c0_14] : memref<1x16xf32, #tpu.memory_space<vmem>>, vector<1x16xf32>
    tpu.vector_store %arg8[%c0_13, %c0_14], %24 {strides = array<i32>} : memref<1x16xf32, #tpu.memory_space<vmem>>, vector<1x16xf32>,
    %c0_i32_15 = arith.constant 0 : i32
    %26 = arith.cmpi eq, %arg0, %c0_i32_15 : i32
    %27 = arith.extui %26 : i1 to i32
    %c0_i32_16 = arith.constant 0 : i32
    %28 = arith.cmpi ne, %27, %c0_i32_16 : i32
    scf.if %28 {
      %c0_17 = arith.constant 0 : index
      %c0_18 = arith.constant 0 : index
      %29 = vector.load %arg8[%c0_17, %c0_18] : memref<1x16xf32, #tpu.memory_space<vmem>>, vector<1x16xf32>
      %c0_19 = arith.constant 0 : index
      %c0_20 = arith.constant 0 : index
      %30 = vector.load %arg1[%c0_19, %c0_20] : memref<8x16xf32, #tpu.memory_space<vmem>>, vector<8x16xf32>
      %cst_21 = arith.constant dense<0.000000e+00> : vector<1x8xf32>
      %31 = tpu.matmul %29, %30, %cst_21 {dimension_numbers = #tpu.dot_dimension_numbers<[1], [1], [0], [0], [0, 0, 1, 0], [], []>} : vector<1x16xf32>, vector<8x16xf32>, vector<1x8xf32> -> vector<1x8xf32>
      %c0_22 = arith.constant 0 : index
      %c0_23 = arith.constant 0 : index
      %32 = memref.load %arg5[%c0_22, %c0_23] : memref<1x1xf32, #tpu.memory_space<smem>>
      %33 = vector.broadcast %32 : f32 to vector<1x8xf32>
      %34 = arith.addf %31, %33 : vector<1x8xf32>
      %c0_24 = arith.constant 0 : index
      %c0_25 = arith.constant 0 : index
      %35 = vector.load %arg6[%c0_24, %c0_25] : memref<1x8xf32, #tpu.memory_space<vmem>>, vector<1x8xf32>
      tpu.vector_store %arg6[%c0_24, %c0_25], %34 {strides = array<i32>} : memref<1x8xf32, #tpu.memory_space<vmem>>, vector<1x8xf32>,
    } else {
    }
    return
  }
  func.func @transform_0(%arg0: i32) -> (i32, i32) {
    %c0_i32 = arith.constant 0 : i32
    %c0_i32_0 = arith.constant 0 : i32
    %c0_i32_1 = arith.constant 0 : i32
    return %c0_i32, %c0_i32_0 : i32, i32
  }
  func.func @transform_1(%arg0: i32) -> (i32, i32) {
    %c0_i32 = arith.constant 0 : i32
    %c0_i32_0 = arith.constant 0 : i32
    return %arg0, %c0_i32 : i32, i32
  }
  func.func @transform_2(%arg0: i32) -> (i32, i32) {
    %c0_i32 = arith.constant 0 : i32
    %c0_i32_0 = arith.constant 0 : i32
    return %arg0, %c0_i32 : i32, i32
  }
  func.func @transform_3(%arg0: i32) -> (i32, i32) {
    %c0_i32 = arith.constant 0 : i32
    %c0_i32_0 = arith.constant 0 : i32
    return %arg0, %c0_i32 : i32, i32
  }
  func.func @transform_4(%arg0: i32) -> (i32, i32) {
    %c0_i32 = arith.constant 0 : i32
    %c0_i32_0 = arith.constant 0 : i32
    %c0_i32_1 = arith.constant 0 : i32
    return %c0_i32, %c0_i32_0 : i32, i32
  }
  func.func @transform_5(%arg0: i32) -> (i32, i32) {
    %c0_i32 = arith.constant 0 : i32
    %c0_i32_0 = arith.constant 0 : i32
    %c0_i32_1 = arith.constant 0 : i32
    return %c0_i32, %c0_i32_0 : i32, i32
  }
  func.func @transform_6(%arg0: i32) -> (i32, i32) {
    %c0_i32 = arith.constant 0 : i32
    %c0_i32_0 = arith.constant 0 : i32
    return %arg0, %c0_i32 : i32, i32
  }
}

</mosaic_0001>

<bundles_post_ra>
// kernel: tpu_custom_call.1
= control target key start
LH: loop header
LB: loop body
LE: loop exit
PB: predicated region body
PF: predicated region fallthrough
CT: control target
= control target key end

     0   :  { %vm46_vm0 = vcmask 130048   ;;  %s412_s0 = inlined_call_operand.vmem [shape: f32[8,16], index: 0, kind: input, shape index: {}]   ;;  %s413_s1 = inlined_call_operand.vmem [shape: f32[32,16], index: 1, kind: input, shape index: {}]   ;;  %s414_s2 = inlined_call_operand.vmem [shape: f32[32,16], index: 2, kind: input, shape index: {}]   ;;  %s415_s3 = inlined_call_operand.vmem [shape: f32[32,1], index: 3, kind: input, shape index: {}]   ;;  %s416_s4 = inlined_call_operand.<no memory space> [shape: f32[1,1], index: 4, kind: input, shape index: {}]   ;;  %s417_s5 = inlined_call_operand.hbm [shape: f32[1,8], index: 5, kind: output, shape index: {0}]   ;;  %s418_s6 = inlined_call_operand.vmem [shape: f32[32,16], index: 6, kind: output, shape index: {1}]  }
   0x1   :  { %v30_v0 = vld [vmem:[%s413_s1] sm:$0xff]  ;;  %v32_v2 = vld [vmem:[%s413_s1 + $0x10] sm:$0xff]  ;;  %v31_v5 = vld [vmem:[%s413_s1 + $0x8] sm:$0xff] }
   0x2   :  { %v34_v1 = vld [vmem:[%s414_s2] sm:$0xff]  ;;  %v36_v4 = vld [vmem:[%s414_s2 + $0x10] sm:$0xff]  ;;  %v35_v6 = vld [vmem:[%s414_s2 + $0x8] sm:$0xff] }
   0x3   :  { %v38_v3 = vadd.f32 %v34_v1, %v30_v0  ;;  %v40_v7 = vadd.f32 %v36_v4, %v32_v2  ;;  %v39_v8 = vadd.f32 %v35_v6, %v31_v5  ;;  %v33_v9 = vld [vmem:[%s413_s1 + $0x18] sm:$0xff] }
   0x4   :  { %v37_v10 = vld [vmem:[%s414_s2 + $0x18] sm:$0xff] }
   0x5   :  { %13 = vsyncpa [#allocation5], 0  ;;  %v42_v11 = vmul.f32 0.1, %v38_v3  ;;  %v41_v12 = vadd.f32 %v37_v10, %v33_v9  ;;  %v44_v13 = vmul.f32 0.1, %v40_v7 }
   0x6   :  { %v43_v14 = vmul.f32 0.1, %v39_v8  ;;  %v296_v20 = vmov 0   ;;  %v97_v36 = vld [vmem:[%s415_s3 + $0x8] sm:$0xff]  ;;  %v98_v37 = vld [vmem:[%s415_s3 + $0x10] sm:$0xff]  ;;  %v96_v38 = vld [vmem:[%s415_s3] sm:$0xff] }
   0x7   :  { %v47_v15 = vsel %vm46_vm0, %v42_v11, -inf  ;;  %v45_v16 = vmul.f32 0.1, %v41_v12  ;;  %v53_v17 = vsel %vm46_vm0, %v44_v13, -inf  ;;  %257 = vset.pattern.permute.xlu1 %v296_v20  ;;  %256 = vset.pattern.permute.xlu0 %v296_v20  ;;  %v99_v44 = vld [vmem:[%s415_s3 + $0x18] sm:$0xff]  ;;  %vm28_vm1 = vcmask 122880  }
   0x8   :  { %48 = vmax.xlane.f32.xlu0 %v47_v15  ;;  %54 = vmax.xlane.f32.xlu1 %v53_v17  ;;  %v50_v18 = vsel %vm46_vm0, %v43_v14, -inf  ;;  %v297_v45 = vmov 0.0   ;;  %v144_v46 = vld [vmem:[%s412_s0] sm:$0xff]  ;;  %vm298_vm2 = vmmov 0   ;;  %s299_s28 = smov [#allocation4]   ;;  %vm223_vm3 = vcmask 57344  }
   0x9   :  { %v56_v19 = vsel %vm46_vm0, %v45_v16, -inf  ;;  %29 = vst.msk [vmem:[#allocation2] sm:$0x1] %vm28_vm1, %v297_v45  ;;  %247 = vmatprep.subr.mxu0 %v297_v45  ;;  %249 = vmatprep.mubr.msk.f32.mxu0 %vm298_vm2, %v297_v45  ;;  %s231_s29 = sshll.u32 %s299_s28, 4  ;;  %s232_s29 = int_to_ptr.vmem [resolvable:$true] %s231_s29 }
   0xa   :  { %248 = vmatpush3.xpose.msk.msra.mxu0 %vm46_vm0, %v144_v46  ;;  %s274_s30 = scalar_lea.vmem %s232_s29, 16  ;;  %s278_s7 = scalar_lea.vmem %s232_s29, 32 }
   0xb   :  { %p275_p0 = scmp.ne.s32.totalorder %s232_s29, %s274_s30  ;;  %p279_p1 = scmp.lt.s32.totalorder %s232_s29, %s232_s29 }
   0xc   :  { %51 = vmax.xlane.f32.xlu0 %v50_v18  ;;  %57 = vmax.xlane.f32.xlu1 %v56_v19  ;;  %v146_v19 = vstv %s416_s4  ;;  %p280_p2 = scmp.lt.s32.totalorder %s278_s7, %s274_s30 }
   0xe   :  { %p281_p3 = por %p280_p2, %p279_p1 }
  0x10   :  { %v95_v15 = vld [vmem:[#allocation2] sm:$0x1]  ;;  %p282_p4 = pnand %p281_p3, %p275_p0 }
  0x91   :  { %v49_v21 = vpop.xlane.xlu0 %48  ;;  %v55_v23 = vpop.xlane.xlu1 %54 }
  0x92   :  { %v59_v22 = vsub.f32 %v42_v11, %v49_v21  ;;  %v61_v24 = vsub.f32 %v44_v13, %v55_v23 }
  0x94   :  { %v63_v25 = vmul.f32 1.442695, %v59_v22  ;;  %v67_v26 = vmul.f32 1.442695, %v61_v24 }
  0x95   :  { %v52_v27 = vpop.xlane.xlu0 %51  ;;  %v58_v39 = vpop.xlane.xlu1 %57 }
  0x96   :  { %258 = vpow2.f32 %v63_v25  ;;  %v60_v28 = vsub.f32 %v43_v14, %v52_v27  ;;  %v62_v40 = vsub.f32 %v45_v16, %v58_v39 }
  0x97   :  { %260 = vpow2.f32 %v67_v26 }
  0x98   :  { %v65_v29 = vmul.f32 1.442695, %v60_v28  ;;  %v69_v41 = vmul.f32 1.442695, %v62_v40 }
  0x9a   :  { %262 = vpow2.f32 %v65_v29 }
  0x9b   :  { %264 = vpow2.f32 %v69_v41 }
  0xa3   :  { %v259_v30 = vpop.eup %258 }
  0xa4   :  { %v261_v31 = vpop.eup %260  ;;  %v71_v32 = vsel %vm46_vm0, %v259_v30, 0.0 }
  0xa5   :  { %72 = vadd.xlane.f32.xlu0 %v71_v32  ;;  %v77_v33 = vsel %vm46_vm0, %v261_v31, 0.0 }
  0xa7   :  { %v263_v34 = vpop.eup %262 }
  0xa8   :  { %v74_v35 = vsel %vm46_vm0, %v263_v34, 0.0  ;;  %v265_v42 = vpop.eup %264 }
  0xa9   :  { %78 = vadd.xlane.f32.xlu0 %v77_v33  ;;  %75 = vadd.xlane.f32.xlu1 %v74_v35  ;;  %v80_v43 = vsel %vm46_vm0, %v265_v42, 0.0 }
  0xba   :  { %107 = vperm.xlu1 %257, %v97_v36  }
  0xbe   :  { %112 = vperm.xlu1 %257, %v98_v37  }
  0xbf   :  { %102 = vperm.xlu0 %256, %v96_v38  }
  0xe2   :  { %81 = vadd.xlane.f32.xlu1 %v80_v43 }
  0xf3   :  { %117 = vperm.xlu1 %257, %v99_v44  }
 0x12e   :  { %v73_v47 = vpop.xlane.xlu0 %72 }
 0x12f   :  { %266 = vrcp.f32 %v73_v47 }
 0x132   :  { %v76_v48 = vpop.xlane.xlu1 %75  ;;  %v79_v49 = vpop.xlane.xlu0 %78 }
 0x133   :  { %268 = vrcp.f32 %v76_v48 }
 0x134   :  { %270 = vrcp.f32 %v79_v49 }
 0x136   :  { %v108_v56 = vpop.permute.xlu1 %107 }
 0x13a   :  { %v113_v57 = vpop.permute.xlu1 %112  ;;  %v103_v59 = vpop.permute.xlu0 %102 }
 0x13c   :  { %v267_v50 = vpop.eup %266 }
 0x13d   :  { %v84_v51 = vmul.f32 %v267_v50, %v259_v30 }
 0x13f   :  { %91 = vst.msk [vmem:[%s418_s6] sm:$0xff] %vm46_vm0, %v84_v51  ;;  %v120_v61 = vmul.f32 %v103_v59, %v84_v51 }
 0x140   :  { %v269_v52 = vpop.eup %268 }
 0x141   :  { %v271_v53 = vpop.eup %270  ;;  %v86_v54 = vmul.f32 %v269_v52, %v263_v34  ;;  %v124_v0 = vsel %vm46_vm0, %v120_v61, 0.0 }
 0x142   :  { %v88_v55 = vmul.f32 %v271_v53, %v261_v31 }
 0x143   :  { %92 = vst.msk [vmem:[%s418_s6 + $0x8] sm:$0xff] %vm46_vm0, %v86_v54  ;;  %v121_v60 = vmul.f32 %v108_v56, %v86_v54 }
 0x144   :  { %93 = vst.msk [vmem:[%s418_s6 + $0x10] sm:$0xff] %vm46_vm0, %v88_v55  ;;  %v122_v63 = vmul.f32 %v113_v57, %v88_v55 }
 0x145   :  { %v125_v62 = vsel %vm46_vm0, %v121_v60, 0.0 }
 0x146   :  { %v126_v2 = vadd.f32 %v125_v62, %v124_v0  ;;  %v127_v5 = vsel %vm46_vm0, %v122_v63, 0.0 }
 0x148   :  { %v128_v7 = vadd.f32 %v127_v5, %v126_v2 }
 0x16b   :  { %v82_v58 = vpop.xlane.xlu1 %81 }
 0x16c   :  { %272 = vrcp.f32 %v82_v58 }
 0x16f   :  { %v118_v4 = vpop.permute.xlu1 %117 }
 0x179   :  { %v273_v1 = vpop.eup %272 }
 0x17a   :  { %v90_v3 = vmul.f32 %v273_v1, %v265_v42 }
 0x17c   :  { %94 = vst.msk [vmem:[%s418_s6 + $0x18] sm:$0xff] %vm46_vm0, %v90_v3  ;;  %v123_v6 = vmul.f32 %v118_v4, %v90_v3 }
 0x17e   :  { %v129_v8 = vsel %vm46_vm0, %v123_v6, 0.0 }
 0x17f   :  { %v130_v9 = vadd.f32 %v129_v8, %v128_v7 }
 0x181   :  { %v131_v10 = vrot.slane %v130_v9, 4 }
 0x183   :  { %v132_v11 = vadd.f32 %v131_v10, %v130_v9 }
 0x185   :  { %v133_v12 = vrot.slane %v132_v11, 2 }
 0x187   :  { %v134_v13 = vadd.f32 %v133_v12, %v132_v11 }
 0x189   :  { %v135_v14 = vrot.slane %v134_v13, 1 }
 0x18b   :  { %v136_v16 = vadd.f32 %v135_v14, %v134_v13 }
 0x18d   :  { %v137_v17 = vadd.f32 %v136_v16, %v95_v15 }
 0x18f   :  { %139 = vst.msk [vmem:[#allocation2] sm:$0x1] %vm28_vm1, %v137_v17 }
 0x196   :  { %v143_v18 = vld [vmem:[#allocation2] sm:$0x1] }
 0x197   :  { %250 = vmatmul.mubr.msk.f32.vlgmr.msra.gmra.mxu0 %vm46_vm0, %v143_v18 }
 0x257   :  { %v219_v20 = vpop.f32.mrf.mxu0 }
 0x258   :  { %v220_v21 = vadd.f32 %v219_v20, %v146_v19 }
 0x259   :  { %v251_v22 = vpop.f32.mrf.mxu0 }
 0x25a   :  { %224 = vst.msk [vmem:[#allocation4] sm:$0x1] %vm223_vm3, %v220_v21 }
 0x25b   :  { %285 = shalt.err (!%p282_p4)
}
 0x25c   :  { %234 = dma.vmem_to_hbm [thread:$0]  %s232_s29, 16, %s417_s5, [#allocation5]  }
 0x25d   :  { %294 = dma.done.wait [#allocation5], 16  }
 0x25e   :  { %295 = vsyncadd [#allocation5], 4294967280 }
 0x25f   :  { %242 = vsyncpa [#allocation5], 1 }

</bundles_post_ra>
